<compile_context>
chip_gen: v5e
topology: v5e:2x2
jax: 0.10.0
libtpu: 0.0.40
codegen_flags: <defaults>
</compile_context>

<pallas_src>
import jax
import jax.numpy as jnp
from jax.experimental import pallas as pl
from jax.experimental.pallas import tpu as pltpu

_LANE = 128


def _round_up(n, m):
    return ((n + m - 1) // m) * m


def _regressor2_kernel(x_ref, w1_ref, b1_ref, w2_ref, b2_ref, w3_ref, b3_ref, o_ref):
    # x: [TB, D_in] (bf16), w*: (in, out) bf16 lane-padded, b*: (1, out) f32, o: [TB, Dp] f32
    x = x_ref[...]

    # hidden1: bf16 MXU matmul, f32 accumulate; bias + sigmoid in f32 (VPU/EUP).
    z1 = jnp.dot(x, w1_ref[...], preferred_element_type=jnp.float32) + b1_ref[...]
    h1 = pl.reciprocal(1.0 + jnp.exp(-z1), approx=True)      # sigmoid: EUP exp + vrcp

    # hidden2
    z2 = jnp.dot(h1.astype(w2_ref.dtype), w2_ref[...],
                 preferred_element_type=jnp.float32) + b2_ref[...]
    h2 = pl.reciprocal(1.0 + jnp.exp(-z2), approx=True)

    # output layer (linear, no activation)
    z3 = jnp.dot(h2.astype(w3_ref.dtype), w3_ref[...],
                 preferred_element_type=jnp.float32) + b3_ref[...]
    o_ref[...] = z3.astype(o_ref.dtype)


def prepare_params(w1, b1, w2, b2, w3, b3, *, compute_dtype=jnp.bfloat16):
    """One-time param prep: transpose to (in, out), zero-pad feature dims to 128
    lanes, cast weights to the MXU compute dtype, keep biases f32 (1, out) rows.

    Torch nn.Linear layout in: w (out, in), b (out,).
    """
    d_in = w1.shape[1]
    h1, h2, d_out = w1.shape[0], w2.shape[0], w3.shape[0]
    h1p, h2p, dp = _round_up(h1, _LANE), _round_up(h2, _LANE), _round_up(d_out, _LANE)

    def pad2(a, rows, cols):
        return jnp.pad(a, ((0, rows - a.shape[0]), (0, cols - a.shape[1])))

    def pad1(a, n):
        return jnp.pad(a, (0, n - a.shape[0]))

    w1_t = pad2(jnp.asarray(w1, jnp.float32).T, d_in, h1p).astype(compute_dtype)  # [D_in, H1p]
    w2_t = pad2(jnp.asarray(w2, jnp.float32).T, h1p, h2p).astype(compute_dtype)   # [H1p, H2p]
    w3_t = pad2(jnp.asarray(w3, jnp.float32).T, h2p, dp).astype(compute_dtype)    # [H2p, Dp]
    b1_r = pad1(jnp.asarray(b1, jnp.float32), h1p).reshape(1, h1p)
    b2_r = pad1(jnp.asarray(b2, jnp.float32), h2p).reshape(1, h2p)
    b3_r = pad1(jnp.asarray(b3, jnp.float32), dp).reshape(1, dp)
    return (w1_t, b1_r, w2_t, b2_r, w3_t, b3_r, d_out)


def regressor2_forward(x, params):
    """x: [B, D_in]; params from prepare_params. Returns [B, outputSize] f32."""
    w1_t, b1_r, w2_t, b2_r, w3_t, b3_r, d_out = params
    B, d_in = x.shape
    h1p, h2p, dp = w1_t.shape[1], w2_t.shape[1], w3_t.shape[1]
    compute_dtype = w1_t.dtype

    # Activations feed the MXU in bf16; avoid re-cast if caller already passes bf16.
    xc = x if x.dtype == compute_dtype else x.astype(compute_dtype)

    # Batch tile: single block for small B, 1024-row tiles otherwise (x+out tiles
    # double-buffered stay well under v7x's 32 MiB scoped-VMEM default).
    tb = B if B <= 1024 else 1024
    grid = (pl.cdiv(B, tb),)

    flops = 2 * B * (d_in * h1p + h1p * h2p + h2p * dp)
    transcendentals = B * (h1p + h2p)                      # exp inside the two sigmoids
    bytes_accessed = (
        xc.size * xc.dtype.itemsize
        + sum(a.size * a.dtype.itemsize for a in (w1_t, b1_r, w2_t, b2_r, w3_t, b3_r))
        + B * dp * 4
    )

    out_padded = pl.pallas_call(
        _regressor2_kernel,
        out_shape=jax.ShapeDtypeStruct((B, dp), jnp.float32),
        grid=grid,
        in_specs=[
            pl.BlockSpec((tb, d_in), lambda i: (i, 0)),     # x tile walks the batch
            pl.BlockSpec((d_in, h1p), lambda i: (0, 0)),    # weights/biases VMEM-resident
            pl.BlockSpec((1, h1p), lambda i: (0, 0)),
            pl.BlockSpec((h1p, h2p), lambda i: (0, 0)),
            pl.BlockSpec((1, h2p), lambda i: (0, 0)),
            pl.BlockSpec((h2p, dp), lambda i: (0, 0)),
            pl.BlockSpec((1, dp), lambda i: (0, 0)),
        ],
        out_specs=pl.BlockSpec((tb, dp), lambda i: (i, 0)), # lane-dense (128-wide) output
        compiler_params=pltpu.CompilerParams(
            dimension_semantics=("parallel",),              # let v7x shard batch over 2 TCs
        ),
        cost_estimate=pl.CostEstimate(
            flops=flops,
            transcendentals=transcendentals,
            bytes_accessed=bytes_accessed,
        ),
    )(xc, w1_t, b1_r, w2_t, b2_r, w3_t, b3_r)

    return out_padded[:, :d_out]


def _reference(x, w1, b1, w2, b2, w3, b3):
    h1 = jax.nn.sigmoid(x @ w1.T + b1)
    h2 = jax.nn.sigmoid(h1 @ w2.T + b2)
    return h2 @ w3.T + b3


if __name__ == "__main__":
    # Small shapes consistent with Regressor2(inputSize, hiddenSizes, outputSize).
    # Non-128-aligned sizes exercise the zero-padding path.
    batch, input_size, hidden_sizes, output_size = 8, 32, (64, 48), 5

    key = jax.random.PRNGKey(0)
    kx, kw1, kb1, kw2, kb2, kw3, kb3 = jax.random.split(key, 7)

    x = jax.random.normal(kx, (batch, input_size), dtype=jnp.float32)
    # torch.nn.Linear parameter layout: weight (out, in), bias (out,)
    w1 = jax.random.normal(kw1, (hidden_sizes[0], input_size), dtype=jnp.float32) * 0.1
    b1 = jax.random.normal(kb1, (hidden_sizes[0],), dtype=jnp.float32) * 0.1
    w2 = jax.random.normal(kw2, (hidden_sizes[1], hidden_sizes[0]), dtype=jnp.float32) * 0.1
    b2 = jax.random.normal(kb2, (hidden_sizes[1],), dtype=jnp.float32) * 0.1
    w3 = jax.random.normal(kw3, (output_size, hidden_sizes[1]), dtype=jnp.float32) * 0.1
    b3 = jax.random.normal(kb3, (output_size,), dtype=jnp.float32) * 0.1

    params = prepare_params(w1, b1, w2, b2, w3, b3)   # one-time prep (padding/transpose/cast)

    out = regressor2_forward(x, params)
    out = jax.block_until_ready(out)

    ref = _reference(x, w1, b1, w2, b2, w3, b3)
    assert out.shape == (batch, output_size)
    # bf16 MXU inputs + approx reciprocal sigmoid vs f32 reference: relaxed tolerance.
    assert jnp.allclose(out, ref, atol=1e-2, rtol=1e-2), "mismatch vs reference"

    print("KERNEL_OK")
</pallas_src>

<mosaic_0001>
module attributes {stable_mosaic.version = 11 : i64} {
  func.func @_regressor2_kernel(%arg0: i32, %arg1: memref<8x32xbf16, #tpu.memory_space<vmem>>, %arg2: memref<32x128xbf16, #tpu.memory_space<vmem>>, %arg3: memref<1x128xf32, #tpu.memory_space<vmem>>, %arg4: memref<128x128xbf16, #tpu.memory_space<vmem>>, %arg5: memref<1x128xf32, #tpu.memory_space<vmem>>, %arg6: memref<128x128xbf16, #tpu.memory_space<vmem>>, %arg7: memref<1x128xf32, #tpu.memory_space<vmem>>, %arg8: memref<8x128xf32, #tpu.memory_space<vmem>>) attributes {dimension_semantics = [#tpu.dimension_semantics<parallel>], iteration_bounds = array<i64: 1>, scalar_prefetch = 0 : i64, scratch_operands = 0 : i64, tpu.core_type = #tpu.core_type<tc>, window_params = [{transform_indices = @transform_0, window_bounds = array<i64: 8, 32>}, {pipeline_mode = #tpu.pipeline_mode<synchronous>, transform_indices = @transform_1, window_bounds = array<i64: 32, 128>}, {pipeline_mode = #tpu.pipeline_mode<synchronous>, transform_indices = @transform_2, window_bounds = array<i64: 1, 128>}, {pipeline_mode = #tpu.pipeline_mode<synchronous>, transform_indices = @transform_3, window_bounds = array<i64: 128, 128>}, {pipeline_mode = #tpu.pipeline_mode<synchronous>, transform_indices = @transform_4, window_bounds = array<i64: 1, 128>}, {pipeline_mode = #tpu.pipeline_mode<synchronous>, transform_indices = @transform_5, window_bounds = array<i64: 128, 128>}, {pipeline_mode = #tpu.pipeline_mode<synchronous>, transform_indices = @transform_6, window_bounds = array<i64: 1, 128>}, {transform_indices = @transform_7, window_bounds = array<i64: 8, 128>}]} {
    %c0 = arith.constant 0 : index
    %c0_0 = arith.constant 0 : index
    %0 = vector.load %arg1[%c0, %c0_0] : memref<8x32xbf16, #tpu.memory_space<vmem>>, vector<8x32xbf16>
    %c0_1 = arith.constant 0 : index
    %c0_2 = arith.constant 0 : index
    %1 = vector.load %arg2[%c0_1, %c0_2] : memref<32x128xbf16, #tpu.memory_space<vmem>>, vector<32x128xbf16>
    %cst = arith.constant dense<0.000000e+00> : vector<8x128xf32>
    %2 = tpu.matmul %0, %1, %cst {dimension_numbers = #tpu.dot_dimension_numbers<[1], [0], [0], [1], [0, 0, 1, 1], [], []>} : vector<8x32xbf16>, vector<32x128xbf16>, vector<8x128xf32> -> vector<8x128xf32>
    %c0_3 = arith.constant 0 : index
    %c0_4 = arith.constant 0 : index
    %3 = vector.load %arg3[%c0_3, %c0_4] : memref<1x128xf32, #tpu.memory_space<vmem>>, vector<1x128xf32>
    %4 = vector.broadcast %3 : vector<1x128xf32> to vector<8x128xf32>
    %5 = arith.addf %2, %4 : vector<8x128xf32>
    %cst_5 = arith.constant 0.000000e+00 : f32
    %6 = vector.broadcast %cst_5 : f32 to vector<8x128xf32>
    %7 = arith.subf %6, %5 : vector<8x128xf32>
    %8 = math.exp %7 : vector<8x128xf32>
    %cst_6 = arith.constant 1.000000e+00 : f32
    %9 = vector.broadcast %cst_6 : f32 to vector<8x128xf32>
    %10 = arith.addf %9, %8 : vector<8x128xf32>
    %11 = tpu.reciprocal %10 {approx = true} : vector<8x128xf32> -> vector<8x128xf32>
    %12 = arith.truncf %11 : vector<8x128xf32> to vector<8x128xbf16>
    %c0_7 = arith.constant 0 : index
    %c0_8 = arith.constant 0 : index
    %13 = vector.load %arg4[%c0_7, %c0_8] : memref<128x128xbf16, #tpu.memory_space<vmem>>, vector<128x128xbf16>
    %cst_9 = arith.constant dense<0.000000e+00> : vector<8x128xf32>
    %14 = tpu.matmul %12, %13, %cst_9 {dimension_numbers = #tpu.dot_dimension_numbers<[1], [0], [0], [1], [0, 0, 1, 1], [], []>} : vector<8x128xbf16>, vector<128x128xbf16>, vector<8x128xf32> -> vector<8x128xf32>
    %c0_10 = arith.constant 0 : index
    %c0_11 = arith.constant 0 : index
    %15 = vector.load %arg5[%c0_10, %c0_11] : memref<1x128xf32, #tpu.memory_space<vmem>>, vector<1x128xf32>
    %16 = vector.broadcast %15 : vector<1x128xf32> to vector<8x128xf32>
    %17 = arith.addf %14, %16 : vector<8x128xf32>
    %cst_12 = arith.constant 0.000000e+00 : f32
    %18 = vector.broadcast %cst_12 : f32 to vector<8x128xf32>
    %19 = arith.subf %18, %17 : vector<8x128xf32>
    %20 = math.exp %19 : vector<8x128xf32>
    %cst_13 = arith.constant 1.000000e+00 : f32
    %21 = vector.broadcast %cst_13 : f32 to vector<8x128xf32>
    %22 = arith.addf %21, %20 : vector<8x128xf32>
    %23 = tpu.reciprocal %22 {approx = true} : vector<8x128xf32> -> vector<8x128xf32>
    %24 = arith.truncf %23 : vector<8x128xf32> to vector<8x128xbf16>
    %c0_14 = arith.constant 0 : index
    %c0_15 = arith.constant 0 : index
    %25 = vector.load %arg6[%c0_14, %c0_15] : memref<128x128xbf16, #tpu.memory_space<vmem>>, vector<128x128xbf16>
    %cst_16 = arith.constant dense<0.000000e+00> : vector<8x128xf32>
    %26 = tpu.matmul %24, %25, %cst_16 {dimension_numbers = #tpu.dot_dimension_numbers<[1], [0], [0], [1], [0, 0, 1, 1], [], []>} : vector<8x128xbf16>, vector<128x128xbf16>, vector<8x128xf32> -> vector<8x128xf32>
    %c0_17 = arith.constant 0 : index
    %c0_18 = arith.constant 0 : index
    %27 = vector.load %arg7[%c0_17, %c0_18] : memref<1x128xf32, #tpu.memory_space<vmem>>, vector<1x128xf32>
    %28 = vector.broadcast %27 : vector<1x128xf32> to vector<8x128xf32>
    %29 = arith.addf %26, %28 : vector<8x128xf32>
    %c0_19 = arith.constant 0 : index
    %c0_20 = arith.constant 0 : index
    %30 = vector.load %arg8[%c0_19, %c0_20] : memref<8x128xf32, #tpu.memory_space<vmem>>, vector<8x128xf32>
    tpu.vector_store %arg8[%c0_19, %c0_20], %29 {strides = array<i32>} : memref<8x128xf32, #tpu.memory_space<vmem>>, vector<8x128xf32>,
    return
  }
  func.func @transform_0(%arg0: i32) -> (i32, i32) {
    %c0_i32 = arith.constant 0 : i32
    %c0_i32_0 = arith.constant 0 : i32
    return %arg0, %c0_i32 : i32, i32
  }
  func.func @transform_1(%arg0: i32) -> (i32, i32) {
    %c0_i32 = arith.constant 0 : i32
    %c0_i32_0 = arith.constant 0 : i32
    %c0_i32_1 = arith.constant 0 : i32
    return %c0_i32, %c0_i32_0 : i32, i32
  }
  func.func @transform_2(%arg0: i32) -> (i32, i32) {
    %c0_i32 = arith.constant 0 : i32
    %c0_i32_0 = arith.constant 0 : i32
    %c0_i32_1 = arith.constant 0 : i32
    return %c0_i32, %c0_i32_0 : i32, i32
  }
  func.func @transform_3(%arg0: i32) -> (i32, i32) {
    %c0_i32 = arith.constant 0 : i32
    %c0_i32_0 = arith.constant 0 : i32
    %c0_i32_1 = arith.constant 0 : i32
    return %c0_i32, %c0_i32_0 : i32, i32
  }
  func.func @transform_4(%arg0: i32) -> (i32, i32) {
    %c0_i32 = arith.constant 0 : i32
    %c0_i32_0 = arith.constant 0 : i32
    %c0_i32_1 = arith.constant 0 : i32
    return %c0_i32, %c0_i32_0 : i32, i32
  }
  func.func @transform_5(%arg0: i32) -> (i32, i32) {
    %c0_i32 = arith.constant 0 : i32
    %c0_i32_0 = arith.constant 0 : i32
    %c0_i32_1 = arith.constant 0 : i32
    return %c0_i32, %c0_i32_0 : i32, i32
  }
  func.func @transform_6(%arg0: i32) -> (i32, i32) {
    %c0_i32 = arith.constant 0 : i32
    %c0_i32_0 = arith.constant 0 : i32
    %c0_i32_1 = arith.constant 0 : i32
    return %c0_i32, %c0_i32_0 : i32, i32
  }
  func.func @transform_7(%arg0: i32) -> (i32, i32) {
    %c0_i32 = arith.constant 0 : i32
    %c0_i32_0 = arith.constant 0 : i32
    return %arg0, %c0_i32 : i32, i32
  }
}

</mosaic_0001>

<bundles_post_ra>
// kernel: tpu_custom_call.1
= control target key start
LH: loop header
LB: loop body
LE: loop exit
PB: predicated region body
PF: predicated region fallthrough
CT: control target
= control target key end

     0   :  { %12 = vsyncpa [#allocation3], 0  ;;  %s629_s0 = inlined_call_operand.hbm [shape: bf16[8,32], index: 0, kind: input, shape index: {}]   ;;  %s630_s1 = inlined_call_operand.hbm [shape: bf16[32,128], index: 1, kind: input, shape index: {}]   ;;  %s631_s2 = inlined_call_operand.vmem [shape: f32[1,128], index: 2, kind: input, shape index: {}]   ;;  %s632_s3 = inlined_call_operand.hbm [shape: bf16[128,128], index: 3, kind: input, shape index: {}]   ;;  %s633_s4 = inlined_call_operand.vmem [shape: f32[1,128], index: 4, kind: input, shape index: {}]   ;;  %s634_s5 = inlined_call_operand.hbm [shape: bf16[128,128], index: 5, kind: input, shape index: {}]   ;;  %s635_s6 = inlined_call_operand.vmem [shape: f32[1,128], index: 6, kind: input, shape index: {}]   ;;  %s636_s7 = inlined_call_operand.hbm [shape: f32[8,128], index: 7, kind: output, shape index: {}]  }
   0x1   :  { %13 = vsyncpa [#allocation6], 0 }
   0x2   :  { %14 = vsyncpa [#allocation9], 0  ;;  %s31_s26 = sshll.u32 %s630_s1, 4  ;;  %s32_s26 = int_to_ptr.hbm [resolvable:$true] %s31_s26 }
   0x3   :  { %15 = vsyncpa [#allocation4], 0  ;;  %s558_s27 = smov [#allocation5]   ;;  %s21_s8 = sshll.u32 %s629_s0, 4  ;;  %s22_s8 = int_to_ptr.hbm [resolvable:$true] %s21_s8 }
   0x4   :  { %s33_s28 = sshll.u32 %s558_s27, 4  ;;  %s559_s9 = smov 64   ;;  %s34_s28 = int_to_ptr.vmem [resolvable:$true] %s33_s28 }
   0x5   :  { %s560_s10 = smov 4   ;;  %s561_s11 = smov [#allocation2]  }
   0x6   :  { %39 = dma.hbm_to_vmem [thread:$0]  %s32_s26, 256, %s34_s28, [#allocation6], %s559_s9, %s559_s9, %s560_s10  }
   0x7   :  { %s23_s12 = sshll.u32 %s561_s11, 4  ;;  %s46_s15 = sshll.u32 %s632_s3, 4  ;;  %s24_s12 = int_to_ptr.vmem [resolvable:$true] %s23_s12  ;;  %s47_s15 = int_to_ptr.hbm [resolvable:$true] %s46_s15 }
   0x8   :  { %26 = dma.hbm_to_vmem [thread:$0]  %s22_s8, 64, %s24_s12, [#allocation3]  }
   0x9   :  { %s61_s17 = sshll.u32 %s634_s5, 4  ;;  %s562_s18 = smov [#allocation7]   ;;  %s62_s17 = int_to_ptr.hbm [resolvable:$true] %s61_s17 }
   0xa   :  { %s48_s19 = sshll.u32 %s562_s18, 4  ;;  %s563_s0 = smov [#allocation8]   ;;  %s49_s19 = int_to_ptr.vmem [resolvable:$true] %s48_s19 }
   0xb   :  { %54 = dma.hbm_to_vmem [thread:$0]  %s47_s15, 1024, %s49_s19, [#allocation6], %s559_s9, %s559_s9, %s560_s10  }
   0xc   :  { %s63_s20 = sshll.u32 %s563_s0, 4  ;;  %s64_s20 = int_to_ptr.vmem [resolvable:$true] %s63_s20 }
   0xd   :  { %69 = dma.hbm_to_vmem [thread:$0]  %s62_s17, 1024, %s64_s20, [#allocation9], %s559_s9, %s559_s9, %s560_s10  }
   0xe   :  { %550 = dma.done.wait [#allocation3], 64  }
   0xf   :  { %551 = vsyncadd [#allocation3], 4294967232 }
  0x10   :  { %552 = dma.done.wait [#allocation6], 1280  }
  0x11   :  { %553 = vsyncadd [#allocation6], 4294966016 }
  0x12   :  { %554 = dma.done.wait [#allocation9], 1024  }
  0x13   :  { %555 = vsyncadd [#allocation9], 4294966272  ;;  %v395_v0 = vld [vmem:[#allocation5 + $0x8] sm:$0xff]  ;;  %v394_v2 = vld [vmem:[#allocation5] sm:$0xff]  ;;  %vm110_vm0 = vcmask 261120   ;;  %s564_s24 = smov [#allocation10]  }
  0x14   :  { %v403_v1 = vld [vmem:[#allocation7 + $0x38] sm:$0xff]  ;;  %120 = vmatpush.bf16.msra.mxu0 %v395_v0  ;;  %v402_v3 = vld [vmem:[#allocation7 + $0x30] sm:$0xff]  ;;  %v89_v4 = vld [vmem:[#allocation2] sm:$0xf]  ;;  %s307_s25 = sshll.u32 %s564_s24, 4  ;;  %s309_s27 = sshll.u32 %s636_s7, 4  ;;  %s308_s25 = int_to_ptr.vmem [resolvable:$true] %s307_s25  ;;  %s310_s27 = int_to_ptr.hbm [resolvable:$true] %s309_s27 }
  0x15   :  { %201 = vmatpush.bf16.msra.mxu1 %v403_v1  ;;  %v401_v5 = vld [vmem:[#allocation7 + $0x28] sm:$0xff]  ;;  %v400_v6 = vld [vmem:[#allocation7 + $0x20] sm:$0xff]  ;;  %v399_v7 = vld [vmem:[#allocation7 + $0x18] sm:$0xff] }
  0x16   :  { %v398_v8 = vld [vmem:[#allocation7 + $0x10] sm:$0xff]  ;;  %v397_v9 = vld [vmem:[#allocation7 + $0x8] sm:$0xff]  ;;  %v396_v10 = vld [vmem:[#allocation7] sm:$0xff] }
  0x17   :  { %v411_v11 = vld [vmem:[#allocation8 + $0x38] sm:$0xff]  ;;  %v410_v12 = vld [vmem:[#allocation8 + $0x30] sm:$0xff]  ;;  %v419_v13 = vld [vmem:[%s631_s2] ss:$0 sm:$0xff] }
  0x18   :  { %121 = vmatpush.bf16.msra.mxu0 %v394_v2  ;;  %288 = vmatpush.bf16.msra.mxu2 %v411_v11  ;;  %v409_v23 = vld [vmem:[#allocation8 + $0x28] sm:$0xff]  ;;  %v408_v24 = vld [vmem:[#allocation8 + $0x20] sm:$0xff]  ;;  %v407_v25 = vld [vmem:[#allocation8 + $0x18] sm:$0xff] }
  0x19   :  { %202 = vmatpush.bf16.msra.mxu1 %v402_v3  ;;  %v406_v26 = vld [vmem:[#allocation8 + $0x10] sm:$0xff]  ;;  %v405_v27 = vld [vmem:[#allocation8 + $0x8] sm:$0xff]  ;;  %v404_v28 = vld [vmem:[#allocation8] sm:$0xff] }
  0x1a   :  { %v420_v29 = vld [vmem:[%s633_s4] ss:$0 sm:$0xff] }
  0x1b   :  { %329 = vmatmul.msk.bf16.vlgmr.msra.gmra.mxu0 %vm110_vm0, %v89_v4  ;;  %v421_v39 = vld [vmem:[%s635_s6] ss:$0 sm:$0xff] }
  0x1c   :  { %289 = vmatpush.bf16.msra.mxu2 %v410_v12 }
  0x1d   :  { %203 = vmatpush.bf16.msra.mxu1 %v401_v5 }
  0x20   :  { %290 = vmatpush.bf16.msra.mxu2 %v409_v23 }
  0x21   :  { %204 = vmatpush.bf16.msra.mxu1 %v400_v6 }
  0x24   :  { %291 = vmatpush.bf16.msra.mxu2 %v408_v24 }
  0x25   :  { %205 = vmatpush.bf16.msra.mxu1 %v399_v7 }
  0x28   :  { %292 = vmatpush.bf16.msra.mxu2 %v407_v25 }
  0x29   :  { %206 = vmatpush.bf16.msra.mxu1 %v398_v8 }
  0x2c   :  { %293 = vmatpush.bf16.msra.mxu2 %v406_v26 }
  0x2d   :  { %207 = vmatpush.bf16.msra.mxu1 %v397_v9 }
  0x30   :  { %294 = vmatpush.bf16.msra.mxu2 %v405_v27 }
  0x31   :  { %208 = vmatpush.bf16.msra.mxu1 %v396_v10 }
  0x34   :  { %295 = vmatpush.bf16.msra.mxu2 %v404_v28 }
  0x98   :  { %v123_v14 = vpop.f32.mrf.mxu0 }
  0x99   :  { %v124_v15 = vadd.f32 %v419_v13, %v123_v14 }
  0x9b   :  { %v127_v16 = vsub.f32 0.0, %v124_v15 }
  0x9d   :  { %v128_v17 = vmul.f32 1.442695, %v127_v16 }
  0x9f   :  { %422 = vpow2.f32 %v128_v17 }
  0xa0   :  { %v125_v18 = vpop.f32.mrf.mxu0 }
  0xa5   :  { %v423_v19 = vpop.eup %422 }
  0xa6   :  { %v130_v20 = vadd.f32 1.0, %v423_v19 }
  0xa8   :  { %424 = vrcp.f32 %v130_v20 }
  0xae   :  { %v425_v21 = vpop.eup %424 }
  0xaf   :  { %v132_v22 = vpack.c.bf16 %v425_v21, %v425_v21 }
  0xb1   :  { %209 = vmatmul.bf16.vlgmr.msra.gmra.mxu1 %v132_v22 }
 0x12e   :  { %v210_v30 = vpop.f32.mrf.mxu1 }
 0x12f   :  { %v211_v31 = vadd.f32 %v420_v29, %v210_v30 }
 0x131   :  { %v214_v32 = vsub.f32 0.0, %v211_v31 }
 0x133   :  { %v215_v33 = vmul.f32 1.442695, %v214_v32 }
 0x135   :  { %426 = vpow2.f32 %v215_v33 }
 0x136   :  { %v212_v34 = vpop.f32.mrf.mxu1 }
 0x13b   :  { %v427_v35 = vpop.eup %426 }
 0x13c   :  { %v217_v36 = vadd.f32 1.0, %v427_v35 }
 0x13e   :  { %428 = vrcp.f32 %v217_v36 }
 0x144   :  { %v429_v37 = vpop.eup %428 }
 0x145   :  { %v219_v38 = vpack.c.bf16 %v429_v37, %v429_v37 }
 0x147   :  { %296 = vmatmul.bf16.vlgmr.msra.gmra.mxu2 %v219_v38 }
 0x1ca   :  { %v297_v40 = vpop.f32.mrf.mxu2 }
 0x1cb   :  { %v298_v41 = vadd.f32 %v421_v39, %v297_v40 }
 0x1cd   :  { %301 = vst [vmem:[#allocation10] sm:$0xff] %v298_v41 }
 0x1ce   :  { %312 = dma.vmem_to_hbm [thread:$0]  %s308_s25, 128, %s310_s27, [#allocation4]  }
 0x1d2   :  { %v299_v42 = vpop.f32.mrf.mxu2 }
 0x1d3   :  { %556 = dma.done.wait [#allocation4], 128  }
 0x1d4   :  { %557 = vsyncadd [#allocation4], 4294967168 }
 0x1d5   :  { %317 = vsyncpa [#allocation3], 1 }
 0x1d6   :  { %318 = vsyncpa [#allocation6], 1 }
 0x1d7   :  { %319 = vsyncpa [#allocation9], 1 }
 0x1d8   :  { %320 = vsyncpa [#allocation4], 1 }

</bundles_post_ra>
